<compile_context>
chip_gen: v7x
topology: tpu7x:2x2x1
jax: 0.10.0
libtpu: 0.0.40
codegen_flags: <defaults>
</compile_context>

<pallas_src>
from functools import partial

import jax
import jax.numpy as jnp
from jax.experimental import pallas as pl
from jax.experimental.pallas import tpu as pltpu

F_IN = 784           # 28 * 28 (natural feature width; equals full array dim in BlockSpecs)
H = 20               # hidden width of the autoencoder
H_PAD = 128          # padded hidden width (one full MXU lane group); weights-only padding
TILE_B_MAX = 1024    # fits v5e 16 MiB scoped default with f32 in/out double-buffering


def _round_up(n, m):
    return ((n + m - 1) // m) * m


def _choose_tiling(B):
    """Return (b_pad, tile_b).  Either one full-extent block, or 8-aligned tiles."""
    if B % 8 != 0 and B <= TILE_B_MAX:
        # Single full-extent block: legal because block dim == array dim; no padding.
        return B, B
    b_pad = _round_up(B, 8)          # at most 7 padded rows (only if B % 8 != 0)
    if b_pad <= 8:
        return b_pad, b_pad
    # Aim for >= 2 grid steps so the "parallel" batch axis shards across v7x's 2 TCs.
    tile_b = min(TILE_B_MAX, _round_up(pl.cdiv(b_pad, 2), 8))
    return b_pad, tile_b


def autoencoder_kernel(x_ref, we_ref, be_ref, wd_ref, bd_ref, y_ref):
    # x_ref : (tile_b, 784) f32        we_ref: (784, 128) bf16    be_ref: (1, 128) f32
    # wd_ref: (128, 784) bf16          bd_ref: (1, 784) f32       y_ref : (tile_b, 784)
    x = x_ref[...].astype(jnp.bfloat16)              # in-kernel cast (free under DMA bound)
    h = jnp.dot(x, we_ref[...], preferred_element_type=jnp.float32) + be_ref[...]
    h = h.astype(jnp.bfloat16)                       # keep decoder matmul on fast bf16 MXU path
    y = jnp.dot(h, wd_ref[...], preferred_element_type=jnp.float32) + bd_ref[...]
    y_ref[...] = y.astype(y_ref.dtype)


@partial(jax.jit, static_argnames=("out_dtype",))
def autoencoder_forward(x_nchw, we, be, wd, bd, out_dtype=jnp.float32):
    """x_nchw: (B, 1, 28, 28) float32 -> (B, 1, 28, 28) out_dtype (default float32)."""
    B = x_nchw.shape[0]
    x_flat = x_nchw.reshape(B, F_IN)                 # free reshape; stays f32 (no extra pass)

    b_pad, tile_b = _choose_tiling(B)
    grid = (pl.cdiv(b_pad, tile_b),)

    if b_pad != B:                                   # rare corner: B > TILE_B_MAX and B % 8 != 0
        x_flat = jnp.pad(x_flat, ((0, b_pad - B), (0, 0)))

    # Only the tiny weights are padded (hidden 20 -> 128); zero pads keep the math exact.
    we_p = jnp.zeros((F_IN, H_PAD), jnp.bfloat16).at[:, :H].set(we.astype(jnp.bfloat16))
    be_p = jnp.zeros((1, H_PAD), jnp.float32).at[0, :H].set(be)
    wd_p = jnp.zeros((H_PAD, F_IN), jnp.bfloat16).at[:H, :].set(wd.astype(jnp.bfloat16))
    bd_p = bd.reshape(1, F_IN).astype(jnp.float32)

    out_itemsize = jnp.dtype(out_dtype).itemsize
    flops = 2 * b_pad * F_IN * H_PAD * 2                       # two matmuls
    bytes_accessed = (b_pad * F_IN * 4                         # x read  (f32)
                      + b_pad * F_IN * out_itemsize            # y write
                      + 2 * F_IN * H_PAD * 2                   # weights (bf16)
                      + (H_PAD + F_IN) * 4)                    # biases  (f32)

    y_p = pl.pallas_call(
        autoencoder_kernel,
        out_shape=jax.ShapeDtypeStruct((b_pad, F_IN), out_dtype),
        grid=grid,
        in_specs=[
            pl.BlockSpec((tile_b, F_IN), lambda i: (i, 0)),    # x: streamed per batch tile
            pl.BlockSpec((F_IN, H_PAD), lambda i: (0, 0)),     # We: VMEM-resident
            pl.BlockSpec((1, H_PAD), lambda i: (0, 0)),        # be
            pl.BlockSpec((H_PAD, F_IN), lambda i: (0, 0)),     # Wd
            pl.BlockSpec((1, F_IN), lambda i: (0, 0)),         # bd
        ],
        out_specs=pl.BlockSpec((tile_b, F_IN), lambda i: (i, 0)),
        compiler_params=pltpu.CompilerParams(
            dimension_semantics=("parallel",),                 # megacore sharding on v7x
            vmem_limit_bytes=32 * 1024 * 1024),
        cost_estimate=pl.CostEstimate(
            flops=flops, transcendentals=0, bytes_accessed=bytes_accessed),
    )(x_flat, we_p, be_p, wd_p, bd_p)

    y = y_p[:B] if b_pad != B else y_p
    return y.reshape(B, 1, 28, 28)


def init_params(key):
    """Deterministic init mimicking nn.Linear default (U[-1/sqrt(fan_in), +1/sqrt(fan_in)])."""
    k1, k2, k3, k4 = jax.random.split(key, 4)
    bound_e = 1.0 / jnp.sqrt(784.0)
    bound_d = 1.0 / jnp.sqrt(20.0)
    # stored transposed: (in_features, out_features)
    we = jax.random.uniform(k1, (784, 20), jnp.float32, -bound_e, bound_e)
    be = jax.random.uniform(k2, (20,), jnp.float32, -bound_e, bound_e)
    wd = jax.random.uniform(k3, (20, 784), jnp.float32, -bound_d, bound_d)
    bd = jax.random.uniform(k4, (784,), jnp.float32, -bound_d, bound_d)
    return we, be, wd, bd


if __name__ == "__main__":
    key = jax.random.PRNGKey(0)
    kx, kp = jax.random.split(key)
    we, be, wd, bd = init_params(kp)

    def ref_bf16(x):
        b = x.shape[0]
        xb = x.reshape(b, F_IN).astype(jnp.bfloat16)
        h = jnp.dot(xb, we.astype(jnp.bfloat16), preferred_element_type=jnp.float32) + be
        h = h.astype(jnp.bfloat16)
        y = jnp.dot(h, wd.astype(jnp.bfloat16), preferred_element_type=jnp.float32) + bd
        return y.reshape(b, 1, 28, 28)

    # B=16 exercises the tiled path (grid of 2, 8-row blocks, "parallel" batch axis);
    # B=100 exercises the single full-extent block path (matches the module's batch_size).
    for B in (16, 100):
        x = jax.random.normal(jax.random.fold_in(kx, B), (B, 1, 28, 28), jnp.float32)
        y = autoencoder_forward(x, we, be, wd, bd, out_dtype=jnp.float32)
        jax.block_until_ready(y)
        assert y.shape == (B, 1, 28, 28) and y.dtype == jnp.float32

        y_ref = ref_bf16(x)
        assert jnp.allclose(y, y_ref, atol=1e-2, rtol=1e-2), float(jnp.max(jnp.abs(y - y_ref)))

        # Looser sanity check against pure-f32 math (bf16 quantization error only).
        y_f32 = ((x.reshape(B, F_IN) @ we + be) @ wd + bd).reshape(B, 1, 28, 28)
        assert jnp.allclose(y, y_f32, atol=5e-2, rtol=5e-2)

    # Optional bf16-output variant (halves write-side HBM traffic).
    x16 = jax.random.normal(kx, (16, 1, 28, 28), jnp.float32)
    y_bf16 = autoencoder_forward(x16, we, be, wd, bd, out_dtype=jnp.bfloat16)
    jax.block_until_ready(y_bf16)
    assert y_bf16.dtype == jnp.bfloat16
    y_f32_out = autoencoder_forward(x16, we, be, wd, bd, out_dtype=jnp.float32)
    assert jnp.allclose(y_bf16.astype(jnp.float32), y_f32_out, atol=5e-2, rtol=5e-2)

    print("KERNEL_OK")
</pallas_src>

<mosaic_0001>
module attributes {stable_mosaic.version = 11 : i64} {
  func.func @autoencoder_kernel(%arg0: i32, %arg1: memref<8x784xf32, #tpu.memory_space<vmem>>, %arg2: memref<784x128xbf16, #tpu.memory_space<vmem>>, %arg3: memref<1x128xf32, #tpu.memory_space<vmem>>, %arg4: memref<128x784xbf16, #tpu.memory_space<vmem>>, %arg5: memref<1x784xf32, #tpu.memory_space<vmem>>, %arg6: memref<8x784xf32, #tpu.memory_space<vmem>>) attributes {dimension_semantics = [#tpu.dimension_semantics<parallel>], iteration_bounds = array<i64: 2>, scalar_prefetch = 0 : i64, scratch_operands = 0 : i64, tpu.core_type = #tpu.core_type<tc>, window_params = [{transform_indices = @transform_0, window_bounds = array<i64: 8, 784>}, {pipeline_mode = #tpu.pipeline_mode<synchronous>, transform_indices = @transform_1, window_bounds = array<i64: 784, 128>}, {pipeline_mode = #tpu.pipeline_mode<synchronous>, transform_indices = @transform_2, window_bounds = array<i64: 1, 128>}, {pipeline_mode = #tpu.pipeline_mode<synchronous>, transform_indices = @transform_3, window_bounds = array<i64: 128, 784>}, {pipeline_mode = #tpu.pipeline_mode<synchronous>, transform_indices = @transform_4, window_bounds = array<i64: 1, 784>}, {transform_indices = @transform_5, window_bounds = array<i64: 8, 784>}]} {
    %c0 = arith.constant 0 : index
    %c0_0 = arith.constant 0 : index
    %0 = vector.load %arg1[%c0, %c0_0] : memref<8x784xf32, #tpu.memory_space<vmem>>, vector<8x784xf32>
    %1 = arith.truncf %0 : vector<8x784xf32> to vector<8x784xbf16>
    %c0_1 = arith.constant 0 : index
    %c0_2 = arith.constant 0 : index
    %2 = vector.load %arg2[%c0_1, %c0_2] : memref<784x128xbf16, #tpu.memory_space<vmem>>, vector<784x128xbf16>
    %cst = arith.constant dense<0.000000e+00> : vector<8x128xf32>
    %3 = tpu.matmul %1, %2, %cst {dimension_numbers = #tpu.dot_dimension_numbers<[1], [0], [0], [1], [0, 0, 1, 1], [], []>} : vector<8x784xbf16>, vector<784x128xbf16>, vector<8x128xf32> -> vector<8x128xf32>
    %c0_3 = arith.constant 0 : index
    %c0_4 = arith.constant 0 : index
    %4 = vector.load %arg3[%c0_3, %c0_4] : memref<1x128xf32, #tpu.memory_space<vmem>>, vector<1x128xf32>
    %5 = vector.broadcast %4 : vector<1x128xf32> to vector<8x128xf32>
    %6 = arith.addf %3, %5 : vector<8x128xf32>
    %7 = arith.truncf %6 : vector<8x128xf32> to vector<8x128xbf16>
    %c0_5 = arith.constant 0 : index
    %c0_6 = arith.constant 0 : index
    %8 = vector.load %arg4[%c0_5, %c0_6] : memref<128x784xbf16, #tpu.memory_space<vmem>>, vector<128x784xbf16>
    %cst_7 = arith.constant dense<0.000000e+00> : vector<8x784xf32>
    %9 = tpu.matmul %7, %8, %cst_7 {dimension_numbers = #tpu.dot_dimension_numbers<[1], [0], [0], [1], [0, 0, 1, 1], [], []>} : vector<8x128xbf16>, vector<128x784xbf16>, vector<8x784xf32> -> vector<8x784xf32>
    %c0_8 = arith.constant 0 : index
    %c0_9 = arith.constant 0 : index
    %10 = vector.load %arg5[%c0_8, %c0_9] : memref<1x784xf32, #tpu.memory_space<vmem>>, vector<1x784xf32>
    %11 = vector.broadcast %10 : vector<1x784xf32> to vector<8x784xf32>
    %12 = arith.addf %9, %11 : vector<8x784xf32>
    %c0_10 = arith.constant 0 : index
    %c0_11 = arith.constant 0 : index
    %13 = vector.load %arg6[%c0_10, %c0_11] : memref<8x784xf32, #tpu.memory_space<vmem>>, vector<8x784xf32>
    tpu.vector_store %arg6[%c0_10, %c0_11], %12 {strides = array<i32>} : memref<8x784xf32, #tpu.memory_space<vmem>>, vector<8x784xf32>,
    return
  }
  func.func @transform_0(%arg0: i32) -> (i32, i32) {
    %c0_i32 = arith.constant 0 : i32
    %c0_i32_0 = arith.constant 0 : i32
    return %arg0, %c0_i32 : i32, i32
  }
  func.func @transform_1(%arg0: i32) -> (i32, i32) {
    %c0_i32 = arith.constant 0 : i32
    %c0_i32_0 = arith.constant 0 : i32
    %c0_i32_1 = arith.constant 0 : i32
    return %c0_i32, %c0_i32_0 : i32, i32
  }
  func.func @transform_2(%arg0: i32) -> (i32, i32) {
    %c0_i32 = arith.constant 0 : i32
    %c0_i32_0 = arith.constant 0 : i32
    %c0_i32_1 = arith.constant 0 : i32
    return %c0_i32, %c0_i32_0 : i32, i32
  }
  func.func @transform_3(%arg0: i32) -> (i32, i32) {
    %c0_i32 = arith.constant 0 : i32
    %c0_i32_0 = arith.constant 0 : i32
    %c0_i32_1 = arith.constant 0 : i32
    return %c0_i32, %c0_i32_0 : i32, i32
  }
  func.func @transform_4(%arg0: i32) -> (i32, i32) {
    %c0_i32 = arith.constant 0 : i32
    %c0_i32_0 = arith.constant 0 : i32
    %c0_i32_1 = arith.constant 0 : i32
    return %c0_i32, %c0_i32_0 : i32, i32
  }
  func.func @transform_5(%arg0: i32) -> (i32, i32) {
    %c0_i32 = arith.constant 0 : i32
    %c0_i32_0 = arith.constant 0 : i32
    return %arg0, %c0_i32 : i32, i32
  }
}

</mosaic_0001>

<bundles_post_ra>
// kernel: autoencoder_forward.1
= control target key start
LH: loop header
LB: loop body
LE: loop exit
PB: predicated region body
PF: predicated region fallthrough
CT: control target
= control target key end

     0   :  { %s1819_s18 = smov 0   ;;  %s2201_s0 = inlined_call_operand.vmem [shape: f32[16,784], index: 0, kind: input, shape index: {}]   ;;  %s2202_s1 = inlined_call_operand.vmem [shape: bf16[784,128], index: 1, kind: input, shape index: {}]   ;;  %s2203_s2 = inlined_call_operand.vmem [shape: f32[1,128], index: 2, kind: input, shape index: {}]   ;;  %s2204_s3 = inlined_call_operand.vmem [shape: bf16[128,784], index: 3, kind: input, shape index: {}]   ;;  %s2205_s4 = inlined_call_operand.vmem [shape: f32[1,784], index: 4, kind: input, shape index: {}]   ;;  %s2206_s5 = inlined_call_operand.vmem [shape: f32[16,784], index: 5, kind: output, shape index: {}]  }
   0x1 LB: > { %s1418_s19 = sadd.s32 4294967295, %s1784_s18   ;;  %p1422_p0 = scmp.ge.s32.totalorder %s1784_s18, 1  ;;  %s1784_s18 = sphi %s1819_s18, %s15_s18  }
   0x2   : > { %p187_p1 = scmp.lt.s32.totalorder %s1784_s18, 3 }
   0x4   : > { %p188_p2 = pnand %p1422_p0, %p187_p1 }
   0x5   : > { %v1649_v0 = vld [vmem:[%s2202_s1 + $0x40] sm:$0xff] (!%p188_p2)   ;;  %v1653_v4 = vld [vmem:[%s2202_s1 + $0x48] sm:$0xff] (!%p188_p2)   ;;  %v1657_v8 = vld [vmem:[%s2202_s1 + $0x50] sm:$0xff] (!%p188_p2)   ;;  %p215_p3 = scmp.lt.s32.totalorder (!%p188_p2), %s1418_s19, 1  ;;  %v1786_v44 = vmov (!%p188_p2), 0.0   ;;  %vm1787_vm0 = vmmov (!%p188_p2), 0  }
   0x6   : > { %191 = sbr.rel (%p188_p2) target bundleno = 539 (0x21b), region = 40  ;;  %v1650_v1 = vld [vmem:[%s2202_s1] sm:$0xff] (!%p188_p2)   ;;  %1534 = vmatprep.subr.bf16.mxu0 (!%p188_p2), %v1649_v0  ;;  %v1654_v5 = vld [vmem:[%s2202_s1 + $0x8] sm:$0xff] (!%p188_p2)   ;;  %v1658_v9 = vld [vmem:[%s2202_s1 + $0x10] sm:$0xff] (!%p188_p2)   ;;  %vm639_vm1 = vcmask (!%p188_p2), 130048  }
   0x7   : > { %v1651_v2 = vld [vmem:[%s2202_s1 + $0xc0] sm:$0xff] (!%p188_p2)   ;;  %1535 = vmatpush3.bf16.msra.mxu0 (!%p188_p2), %v1650_v1  ;;  %v1655_v6 = vld [vmem:[%s2202_s1 + $0xc8] sm:$0xff] (!%p188_p2)   ;;  %v1659_v10 = vld [vmem:[%s2202_s1 + $0xd0] sm:$0xff] (!%p188_p2)  }
   0x8   : > { %v1652_v3 = vld [vmem:[%s2202_s1 + $0x80] sm:$0xff] (!%p188_p2)   ;;  %1556 = vmatprep.subr.bf16.mxu1 (!%p188_p2), %v1651_v2  ;;  %1536 = vmatprep.subr.bf16.mxu0 (!%p188_p2), %v1653_v4  ;;  %v1656_v7 = vld [vmem:[%s2202_s1 + $0x88] sm:$0xff] (!%p188_p2)   ;;  %v1660_v11 = vld [vmem:[%s2202_s1 + $0x90] sm:$0xff] (!%p188_p2)  }
   0x9   : > { %1557 = vmatpush3.bf16.msra.mxu1 (!%p188_p2), %v1652_v3  ;;  %v1661_v12 = vld [vmem:[%s2202_s1 + $0x58] sm:$0xff] (!%p188_p2)   ;;  %v1665_v16 = vld [vmem:[%s2202_s1 + $0x60] sm:$0xff] (!%p188_p2)   ;;  %v1669_v20 = vld [vmem:[%s2202_s1 + $0x68] sm:$0xff] (!%p188_p2)  }
   0xa   : > { %1558 = vmatprep.subr.bf16.mxu1 (!%p188_p2), %v1655_v6  ;;  %v1662_v13 = vld [vmem:[%s2202_s1 + $0x18] sm:$0xff] (!%p188_p2)   ;;  %v1666_v17 = vld [vmem:[%s2202_s1 + $0x20] sm:$0xff] (!%p188_p2)   ;;  %v1670_v21 = vld [vmem:[%s2202_s1 + $0x28] sm:$0xff] (!%p188_p2)  }
   0xb   : > { %1537 = vmatpush3.bf16.msra.mxu0 (!%p188_p2), %v1654_v5  ;;  %v1663_v14 = vld [vmem:[%s2202_s1 + $0xd8] sm:$0xff] (!%p188_p2)   ;;  %v1667_v18 = vld [vmem:[%s2202_s1 + $0xe0] sm:$0xff] (!%p188_p2)   ;;  %v1671_v22 = vld [vmem:[%s2202_s1 + $0xe8] sm:$0xff] (!%p188_p2)  }
   0xc   : > { %1538 = vmatprep.subr.bf16.mxu0 (!%p188_p2), %v1657_v8  ;;  %v1664_v15 = vld [vmem:[%s2202_s1 + $0x98] sm:$0xff] (!%p188_p2)   ;;  %v1668_v19 = vld [vmem:[%s2202_s1 + $0xa0] sm:$0xff] (!%p188_p2)   ;;  %v1672_v23 = vld [vmem:[%s2202_s1 + $0xa8] sm:$0xff] (!%p188_p2)  }
   0xd   : > { %1559 = vmatpush3.bf16.msra.mxu1 %v1656_v7  ;;  %s2208_s19 = smov (!%p215_p3, %s1418_s19), 1  ;;  %v1673_v24 = vld [vmem:[%s2202_s1 + $0x70] sm:$0xff]   ;;  %v1677_v28 = vld [vmem:[%s2202_s1 + $0x78] sm:$0xff]   ;;  %v1681_v36 = vld [vmem:[%s2202_s1 + $0x140] sm:$0xff]  }
   0xe   : > { %1560 = vmatprep.subr.bf16.mxu1 %v1659_v10  ;;  %s1637_s24 = smul.u32 56, %s2208_s19  ;;  %v1674_v25 = vld [vmem:[%s2202_s1 + $0x30] sm:$0xff]   ;;  %v1678_v29 = vld [vmem:[%s2202_s1 + $0x38] sm:$0xff]   ;;  %v1682_v39 = vld [vmem:[%s2202_s1 + $0x100] sm:$0xff]  }
   0xf   : > { %1539 = vmatpush3.bf16.msra.mxu0 %v1658_v9  ;;  %v1675_v26 = vld [vmem:[%s2202_s1 + $0xf0] sm:$0xff]   ;;  %v1679_v30 = vld [vmem:[%s2202_s1 + $0xf8] sm:$0xff]   ;;  %v1683_v42 = vld [vmem:[%s2202_s1 + $0x148] sm:$0xff]  }
  0x10   : > { %1540 = vmatprep.subr.bf16.mxu0 %v1661_v12  ;;  %v1676_v27 = vld [vmem:[%s2202_s1 + $0xb0] sm:$0xff]   ;;  %s1926_s10 = scalar_lea.vmem %s2201_s0, %s1637_s24  ;;  %v1680_v33 = vld [vmem:[%s2202_s1 + $0xb8] sm:$0xff]   ;;  %v1684_v43 = vld [vmem:[%s2202_s1 + $0x108] sm:$0xff]  }
  0x11   : > { %1561 = vmatpush3.bf16.msra.mxu1 %v1660_v11  ;;  %v227_v31 = vld [vmem:[%s1926_s10 + $0x8] sm:$0xff]  ;;  %v226_v34 = vld [vmem:[%s1926_s10] sm:$0xff]  ;;  %v229_v37 = vld [vmem:[%s1926_s10 + $0x18] sm:$0xff] }
  0x12   : > { %1562 = vmatprep.subr.bf16.mxu1 %v1663_v14  ;;  %v234_v32 = vpack.c.bf16 %v227_v31, %v227_v31  ;;  %v233_v35 = vpack.c.bf16 %v226_v34, %v226_v34  ;;  %v236_v38 = vpack.c.bf16 %v229_v37, %v229_v37  ;;  %v228_v40 = vld [vmem:[%s1926_s10 + $0x10] sm:$0xff]  ;;  %v1687_v47 = vld [vmem:[%s2202_s1 + $0x158] sm:$0xff]   ;;  %v1689_v49 = vld [vmem:[%s2202_s1 + $0x160] sm:$0xff]  }
  0x13   : > { %1541 = vmatpush3.bf16.msra.mxu0 %v1662_v13  ;;  %v235_v41 = vpack.c.bf16 %v228_v40, %v228_v40  ;;  %v1685_v45 = vld [vmem:[%s2202_s1 + $0x150] sm:$0xff]   ;;  %v1688_v48 = vld [vmem:[%s2202_s1 + $0x118] sm:$0xff]   ;;  %v1690_v50 = vld [vmem:[%s2202_s1 + $0x120] sm:$0xff]  }
  0x14   : > { %1542 = vmatprep.subr.bf16.mxu0 %v1665_v16  ;;  %675 = vmatprep.mubr.bf16.mxu0 %v234_v32  ;;  %v1686_v46 = vld [vmem:[%s2202_s1 + $0x110] sm:$0xff]   ;;  %v1691_v51 = vld [vmem:[%s2202_s1 + $0x168] sm:$0xff]   ;;  %v1697_v53 = vld [vmem:[%s2202_s1 + $0x180] sm:$0xff]  }
  0x15   : > { %1563 = vmatpush3.bf16.msra.mxu1 %v1664_v15  ;;  %715 = vmatprep.mubr.bf16.mxu1 %v236_v38  ;;  %v1692_v52 = vld [vmem:[%s2202_s1 + $0x128] sm:$0xff]   ;;  %v1693_v55 = vld [vmem:[%s2202_s1 + $0x170] sm:$0xff]   ;;  %v1695_v60 = vld [vmem:[%s2202_s1 + $0x178] sm:$0xff]  }
  0x16   : > { %1564 = vmatprep.subr.bf16.mxu1 %v1667_v18  ;;  %v231_v54 = vld [vmem:[%s1926_s10 + $0x28] sm:$0xff]  ;;  %v232_v57 = vld [vmem:[%s1926_s10 + $0x30] sm:$0xff]  ;;  %v1696_v61 = vld [vmem:[%s2202_s1 + $0x138] sm:$0xff]  }
  0x17   : > { %1543 = vmatpush3.bf16.msra.mxu0 %v1666_v17  ;;  %v238_v56 = vpack.c.bf16 %v231_v54, %v231_v54  ;;  %v239_v58 = vpack.c.bf16 %v232_v57, %v232_v57  ;;  %v1694_v59 = vld [vmem:[%s2202_s1 + $0x130] sm:$0xff]   ;;  %v230_v62 = vld [vmem:[%s1926_s10 + $0x20] sm:$0xff]  ;;  %v1703_v3 = vld [vmem:[%s2204_s3 + $0xc] ss:$28 sps:$4 sm:$0xff]   ;;  %s2188_s10 = scalar_lea.vmem %s2206_s5, %s1637_s24 }
  0x18   : > { %1544 = vmatprep.subr.bf16.mxu0 %v1669_v20  ;;  %v237_v63 = vpack.c.bf16 %v230_v62, %v230_v62  ;;  %v1698_v0 = vld [vmem:[%s2204_s3] ss:$28 sps:$4 sm:$0xff]   ;;  %v1701_v2 = vld [vmem:[%s2204_s3 + $0x8] ss:$28 sps:$4 sm:$0xff]   ;;  %v1704_v6 = vld [vmem:[%s2204_s3 + $0x38] ss:$28 sps:$4 sm:$0xff]  }
  0x19   : > { %1565 = vmatpush3.bf16.msra.mxu1 %v1668_v19  ;;  %v1700_v1 = vld [vmem:[%s2204_s3 + $0x4] ss:$28 sps:$4 sm:$0xff]   ;;  %v1706_v4 = vld [vmem:[%s2204_s3 + $0x3c] ss:$28 sps:$4 sm:$0xff]   ;;  %v1712_v8 = vld [vmem:[%s2204_s3 + $0x74] ss:$28 sps:$4 sm:$0xff]  }
  0x1a   : > { %1566 = vmatprep.subr.bf16.mxu1 %v1671_v22  ;;  %v1709_v5 = vld [vmem:[%s2204_s3 + $0x44] ss:$28 sps:$4 sm:$0xff]   ;;  %v1715_v9 = vld [vmem:[%s2204_s3 + $0x7c] ss:$28 sps:$4 sm:$0xff]   ;;  %v1710_v10 = vld [vmem:[%s2204_s3 + $0x70] ss:$28 sps:$4 sm:$0xff]  }
  0x1b   : > { %1545 = vmatpush3.bf16.msra.mxu0 %v1670_v21  ;;  %v1707_v7 = vld [vmem:[%s2204_s3 + $0x40] ss:$28 sps:$4 sm:$0xff]   ;;  %v1713_v11 = vld [vmem:[%s2204_s3 + $0x78] ss:$28 sps:$4 sm:$0xff]   ;;  %v1718_v12 = vld [vmem:[%s2204_s3 + $0xac] ss:$28 sps:$4 sm:$0xff]  }
  0x1c   : > { %1546 = vmatprep.subr.bf16.mxu0 %v1673_v24  ;;  %v1721_v13 = vld [vmem:[%s2204_s3 + $0xb4] ss:$28 sps:$4 sm:$0xff]   ;;  %v1716_v14 = vld [vmem:[%s2204_s3 + $0xa8] ss:$28 sps:$4 sm:$0xff]   ;;  %v1722_v18 = vld [vmem:[%s2204_s3 + $0xe0] ss:$28 sps:$4 sm:$0xff]  }
  0x1d   : > { %1567 = vmatpush3.bf16.msra.mxu1 %v1672_v23  ;;  %v1719_v15 = vld [vmem:[%s2204_s3 + $0xb0] ss:$28 sps:$4 sm:$0xff]   ;;  %v1724_v16 = vld [vmem:[%s2204_s3 + $0xe4] ss:$28 sps:$4 sm:$0xff]   ;;  %v1730_v20 = vld [vmem:[%s2204_s3 + $0x11c] ss:$28 sps:$4 sm:$0xff]  }
  0x1e   : > { %1568 = vmatprep.subr.bf16.mxu1 %v1675_v26  ;;  %v1727_v17 = vld [vmem:[%s2204_s3 + $0xec] ss:$28 sps:$4 sm:$0xff]   ;;  %v1733_v21 = vld [vmem:[%s2204_s3 + $0x124] ss:$28 sps:$4 sm:$0xff]   ;;  %v1728_v22 = vld [vmem:[%s2204_s3 + $0x118] ss:$28 sps:$4 sm:$0xff]  }
  0x1f   : > { %1547 = vmatpush3.bf16.msra.mxu0 %v1674_v25  ;;  %v1725_v19 = vld [vmem:[%s2204_s3 + $0xe8] ss:$28 sps:$4 sm:$0xff]   ;;  %v1731_v23 = vld [vmem:[%s2204_s3 + $0x120] ss:$28 sps:$4 sm:$0xff]   ;;  %v1736_v24 = vld [vmem:[%s2204_s3 + $0x154] ss:$28 sps:$4 sm:$0xff]  }
  0x20   : > { %1548 = vmatprep.subr.bf16.mxu0 %v1677_v28  ;;  %v1739_v25 = vld [vmem:[%s2204_s3 + $0x15c] ss:$28 sps:$4 sm:$0xff]   ;;  %v1734_v26 = vld [vmem:[%s2204_s3 + $0x150] ss:$28 sps:$4 sm:$0xff]  }
  0x21   : > { %1569 = vmatpush3.bf16.msra.mxu1 %v1676_v27  ;;  %v1737_v27 = vld [vmem:[%s2204_s3 + $0x158] ss:$28 sps:$4 sm:$0xff]   ;;  %v1742_v28 = vld [vmem:[%s2204_s3 + $0x18c] ss:$28 sps:$4 sm:$0xff]  }
  0x22   : > { %1570 = vmatprep.subr.bf16.mxu1 %v1679_v30  ;;  %v1740_v30 = vld [vmem:[%s2204_s3 + $0x188] ss:$28 sps:$4 sm:$0xff]   ;;  %v1743_v31 = vld [vmem:[%s2204_s3 + $0x190] ss:$28 sps:$4 sm:$0xff]  }
  0x23   : > { %1549 = vmatpush3.bf16.msra.mxu0 %v1678_v29  ;;  %v1745_v29 = vld [vmem:[%s2204_s3 + $0x194] ss:$28 sps:$4 sm:$0xff]   ;;  %v1752_v62 = vld [vmem:[%s2204_s3 + $0x4c] ss:$28 sps:$4 sm:$0xff]  }
  0x24   : > { %1578 = vmatprep.subr.bf16.mxu0 %v1681_v36  ;;  %v1748_v32 = vld [vmem:[%s2204_s3 + $0x14] ss:$28 sps:$4 sm:$0xff]  }
  0x25   : > { %1571 = vmatpush3.bf16.msra.mxu1 %v1680_v33  ;;  %v1788_v33 = vmov 0  }
  0x26   : > { %676 = vmatmul.mubr.bf16.vlgmr.msra.gmra.mrb[0].mxu0 %v233_v35  ;;  %1611 = vmatprep.subr.bf16.mxu1 %v1786_v44  ;;  %v1425_v35 = vld [vmem:[%s2203_s2] ss:$0 sm:$0xff] }
  0x27   : > { %1579 = vmatpush3.bf16.msra.mxu0 %v1682_v39  ;;  %755 = vmatprep.mubr.bf16.mxu0 %v238_v56 }
  0x28   : > { %716 = vmatmul.mubr.bf16.vlgmr.msra.gmra.mrb[0].mxu1 %v235_v41  ;;  %1580 = vmatprep.subr.bf16.mxu0 %v1683_v42 }
  0x29   : > { %1613 = vmatprep.mubr.msk.bf16.mxu1 %vm1787_vm0, %v1786_v44  ;;  %1612 = vmatpush3.bf16.msra.mxu1 %v1697_v53 }
  0x2a   : > { %1193 = vmatprep.subr.bf16.mxu1 %v1700_v1  ;;  %v1756_v1 = vld [vmem:[%s2204_s3 + $0x84] ss:$28 sps:$4 sm:$0xff]  }
  0x2b   : > { %1581 = vmatpush3.bf16.msra.mxu0 %v1684_v43 }
  0x2c   : > { %1582 = vmatprep.subr.bf16.mxu0 %v1685_v45 }
  0x2f   : > { %1583 = vmatpush3.bf16.msra.mxu0 %v1686_v46 }
  0x30   : > { %1584 = vmatprep.subr.bf16.mxu0 %v1687_v47  ;;  %1614 = vmatmul.mubr.msk.bf16.vlgmr.msra.gmra.mrb[4].mxu1 %vm639_vm1, %v239_v58 }
  0x31   : > { %1194 = vmatpush1.bf16.msra.mxu1 %v1698_v0  ;;  %1225 = vmatprep.mubr.bf16.mxu1 %v1788_v33  ;;  %v1753_v0 = vld [vmem:[%s2204_s3 + $0x50] ss:$28 sps:$4 sm:$0xff]  }
  0x32   : > { %1195 = vmatprep.subr.bf16.mxu1 %v1706_v4  ;;  %v1760_v4 = vld [vmem:[%s2204_s3 + $0xbc] ss:$28 sps:$4 sm:$0xff]  }
  0x33   : > { %1585 = vmatpush3.bf16.msra.mxu0 %v1688_v48 }
  0x34   : > { %1586 = vmatprep.subr.bf16.mxu0 %v1689_v49 }
  0x35   : > { %1196 = vmatpush1.bf16.msra.mxu1 %v1704_v6  ;;  %v1761_v6 = vld [vmem:[%s2204_s3 + $0xc0] ss:$28 sps:$4 sm:$0xff]  }
  0x36   : > { %1197 = vmatprep.subr.bf16.mxu1 %v1712_v8  ;;  %v1762_v8 = vld [vmem:[%s2204_s3 + $0xf0] ss:$28 sps:$4 sm:$0xff]  }
  0x37   : > { %1587 = vmatpush3.bf16.msra.mxu0 %v1690_v50 }
  0x38   : > { %1588 = vmatprep.subr.bf16.mxu0 %v1691_v51 }
  0x39   : > { %1198 = vmatpush1.bf16.msra.mxu1 %v1710_v10  ;;  %v1768_v10 = vld [vmem:[%s2204_s3 + $0x12c] ss:$28 sps:$4 sm:$0xff]  }
  0x3a   : > { %1199 = vmatprep.subr.bf16.mxu1 %v1718_v12  ;;  %v1769_v12 = vld [vmem:[%s2204_s3 + $0x130] ss:$28 sps:$4 sm:$0xff]  }
  0x3b   : > { %1589 = vmatpush3.bf16.msra.mxu0 %v1692_v52 }
  0x3c   : > { %1590 = vmatprep.subr.bf16.mxu0 %v1693_v55 }
  0x3d   : > { %1200 = vmatpush1.bf16.msra.mxu1 %v1716_v14  ;;  %v1770_v14 = vld [vmem:[%s2204_s3 + $0x160] ss:$28 sps:$4 sm:$0xff]  }
  0x3e   : > { %1201 = vmatprep.subr.bf16.mxu1 %v1724_v16  ;;  %v1776_v16 = vld [vmem:[%s2204_s3 + $0x19c] ss:$28 sps:$4 sm:$0xff]  }
  0x3f   : > { %1591 = vmatpush3.bf16.msra.mxu0 %v1694_v59  ;;  %v1746_v59 = vld [vmem:[%s2204_s3 + $0x10] ss:$28 sps:$4 sm:$0xff]  }
  0x40   : > { %1592 = vmatprep.subr.bf16.mxu0 %v1695_v60  ;;  %v1749_v60 = vld [vmem:[%s2204_s3 + $0x18] ss:$28 sps:$4 sm:$0xff]  }
  0x41   : > { %1202 = vmatpush1.bf16.msra.mxu1 %v1722_v18  ;;  %v1777_v18 = vld [vmem:[%s2204_s3 + $0x1a0] ss:$28 sps:$4 sm:$0xff]  }
  0x42   : > { %1203 = vmatprep.subr.bf16.mxu1 %v1730_v20 }
  0x43   : > { %1593 = vmatpush3.bf16.msra.mxu0 %v1696_v61 }
  0x44   : > { %1234 = vmatprep.subr.bf16.mxu0 %v1703_v3  ;;  %v1757_v3 = vld [vmem:[%s2204_s3 + $0x88] ss:$28 sps:$4 sm:$0xff]  }
  0x45   : > { %1204 = vmatpush1.bf16.msra.mxu1 %v1728_v22 }
  0x46   : > { %756 = vmatmul.mubr.bf16.vlgmr.msra.gmra.mrb[4].mxu0 %v237_v63  ;;  %1205 = vmatprep.subr.bf16.mxu1 %v1736_v24  ;;  %v1750_v63 = vld [vmem:[%s2204_s3 + $0x48] ss:$28 sps:$4 sm:$0xff]  }
  0x47   : > { %1235 = vmatpush1.bf16.msra.mxu0 %v1701_v2  ;;  %1266 = vmatprep.mubr.bf16.mxu0 %v1788_v33  ;;  %v1754_v2 = vld [vmem:[%s2204_s3 + $0x80] ss:$28 sps:$4 sm:$0xff]  }
  0x48   : > { %1236 = vmatprep.subr.bf16.mxu0 %v1709_v5  ;;  %v1758_v5 = vld [vmem:[%s2204_s3 + $0xb8] ss:$28 sps:$4 sm:$0xff]  }
  0x49   : > { %1206 = vmatpush1.bf16.msra.mxu1 %v1734_v26 }
  0x4a   : > { %1207 = vmatprep.subr.bf16.mxu1 %v1742_v28 }
  0x4b   : > { %1237 = vmatpush1.bf16.msra.mxu0 %v1707_v7  ;;  %v1764_v7 = vld [vmem:[%s2204_s3 + $0xf4] ss:$28 sps:$4 sm:$0xff]  }
  0x4c   : > { %1238 = vmatprep.subr.bf16.mxu0 %v1715_v9  ;;  %v1765_v9 = vld [vmem:[%s2204_s3 + $0xf8] ss:$28 sps:$4 sm:$0xff]  }
  0x4d   : > { %1208 = vmatpush1.bf16.msra.mxu1 %v1740_v30 }
  0x4e   : > { %1275 = vmatprep.subr.bf16.mxu1 %v1748_v32 }
  0x4f   : > { %1239 = vmatpush1.bf16.msra.mxu0 %v1713_v11  ;;  %v1766_v11 = vld [vmem:[%s2204_s3 + $0x128] ss:$28 sps:$4 sm:$0xff]  }
  0x50   : > { %1240 = vmatprep.subr.bf16.mxu0 %v1721_v13  ;;  %v1772_v13 = vld [vmem:[%s2204_s3 + $0x164] ss:$28 sps:$4 sm:$0xff]  }
  0x53   : > { %1241 = vmatpush1.bf16.msra.mxu0 %v1719_v15  ;;  %v1773_v15 = vld [vmem:[%s2204_s3 + $0x168] ss:$28 sps:$4 sm:$0xff]  }
  0x54   : > { %1242 = vmatprep.subr.bf16.mxu0 %v1727_v17  ;;  %v1774_v17 = vld [vmem:[%s2204_s3 + $0x198] ss:$28 sps:$4 sm:$0xff]  }
  0x57   : > { %1243 = vmatpush1.bf16.msra.mxu0 %v1725_v19  ;;  %v870_v19 = vlaneseq }
  0x58   : > { %1244 = vmatprep.subr.bf16.mxu0 %v1733_v21 }
  0x59   : > { %v871_v20 = vshrl.u32 %v870_v19, 7 }
  0x5b   : > { %1245 = vmatpush1.bf16.msra.mxu0 %v1731_v23  ;;  %v872_v21 = vsub.s32 0, %v871_v20  ;;  %v880_v22 = vsub.s32 2, %v871_v20  ;;  %v868_v23 = vld [vmem:[%s2205_s4] sm:$0x7f]  ;;  %v876_v24 = vsub.s32 1, %v871_v20 }
  0x5c   : > { %1246 = vmatprep.subr.bf16.mxu0 %v1739_v25  ;;  %v884_v25 = vsub.s32 3, %v871_v20 }
  0x5d   : > { %v873_v26 = vrot.slane %v868_v23, %v872_v21  ;;  %v877_v28 = vrot.slane %v868_v23, %v876_v24 }
  0x5f   : > { %1247 = vmatpush1.bf16.msra.mxu0 %v1737_v27  ;;  %v881_v27 = vrot.slane %v868_v23, %v880_v22 }
  0x60   : > { %1248 = vmatprep.subr.bf16.mxu0 %v1745_v29  ;;  %v885_v29 = vrot.slane %v868_v23, %v884_v25 }
  0x63   : > { %1249 = vmatpush1.bf16.msra.mxu0 %v1743_v31 }
  0x64   : > { %1617 = vmatprep.subr.bf16.mxu0 %v1786_v44 }
  0xf9   : > { %v1550_v34 = vpop.f32.mrb[0].mxu0 }
  0xfa   : > { %v1551_v36 = vpop.f32.mrb[1].mxu0 }
  0xfb   : > { %v1552_v37 = vadd.f32 %v1551_v36, %v1550_v34  ;;  %v1553_v38 = vpop.f32.mrb[2].mxu0  ;;  %v1572_v39 = vpop.f32.mrb[0].mxu1 }
  0xfc   : > { %v1554_v40 = vpop.f32.mrb[3].mxu0  ;;  %v1573_v42 = vpop.f32.mrb[1].mxu1 }
  0xfd   : > { %v678_v41 = vadd.f32 %v1552_v37, %v1425_v35  ;;  %v1574_v43 = vadd.f32 %v1573_v42, %v1572_v39  ;;  %v1575_v45 = vpop.f32.mrb[2].mxu1  ;;  %v896_v42 = vsub.s32 6, %v871_v20 }
  0xfe   : > { %v1576_v46 = vpop.f32.mrb[3].mxu1 }
  0xff   : > { %v718_v47 = vadd.f32 %v1574_v43, %v678_v41  ;;  %v888_v41 = vsub.s32 4, %v871_v20  ;;  %v892_v43 = vsub.s32 5, %v871_v20  ;;  %v897_v46 = vrot.slane %v868_v23, %v896_v42 }
 0x101   : > { %v889_v45 = vrot.slane %v868_v23, %v888_v41 }
 0x103   : > { %v797_v48 = vpop.f32.mrb[4].mxu1 }
 0x104   : > { %v1615_v49 = vpop.f32.mrb[5].mxu1 }
 0x105   : > { %v800_v50 = vpop.f32.mrb[6].mxu1 }
 0x106   : > { %v1616_v51 = vpop.f32.mrb[7].mxu1 }
 0x119   : > { %v1594_v52 = vpop.f32.mrb[4].mxu0 }
 0x11a   : > { %v1595_v53 = vpop.f32.mrb[5].mxu0 }
 0x11b   : > { %v1596_v54 = vadd.f32 %v1595_v53, %v1594_v52  ;;  %v1597_v55 = vpop.f32.mrb[6].mxu0 }
 0x11c   : > { %v1598_v56 = vpop.f32.mrb[7].mxu0 }
 0x11d   : > { %v758_v57 = vadd.f32 %v1596_v54, %v718_v47  ;;  %v893_v47 = vrot.slane %v868_v23, %v892_v43 }
 0x11f   : > { %v798_v58 = vadd.f32 %v797_v48, %v758_v57 }
 0x121   : > { %v803_v61 = vpack.c.bf16 %v798_v58, %v798_v58 }
 0x123   : > { %1226 = vmatmul.mubr.bf16.vlgmr.msra.gmra.mrb[8].mxu1 %v803_v61  ;;  %1267 = vmatmul.mubr.bf16.vlgmr.msra.gmra.mrb[8].mxu0 %v803_v61 }
 0x124   : > { %1276 = vmatpush1.bf16.msra.mxu1 %v1746_v59  ;;  %1618 = vmatpush3.bf16.msra.mxu0 %v1749_v60 }
 0x125   : > { %1277 = vmatprep.subr.bf16.mxu1 %v1752_v62  ;;  %1619 = vmatprep.subr.bf16.mxu0 %v1786_v44 }
 0x126   : > { %1307 = vmatprep.mubr.bf16.mxu1 %v1788_v33  ;;  %1633 = vmatprep.mubr.msk.bf16.mxu0 %vm1787_vm0, %v1786_v44 }
 0x128   : > { %1278 = vmatpush1.bf16.msra.mxu1 %v1750_v63  ;;  %1620 = vmatpush3.bf16.msra.mxu0 %v1753_v0 }
 0x129   : > { %1279 = vmatprep.subr.bf16.mxu1 %v1756_v1  ;;  %1621 = vmatprep.subr.bf16.mxu0 %v1786_v44 }
 0x12c   : > { %1280 = vmatpush1.bf16.msra.mxu1 %v1754_v2  ;;  %1622 = vmatpush3.bf16.msra.mxu0 %v1757_v3 }
 0x12d   : > { %1281 = vmatprep.subr.bf16.mxu1 %v1760_v4  ;;  %1623 = vmatprep.subr.bf16.mxu0 %v1786_v44 }
 0x130   : > { %1282 = vmatpush1.bf16.msra.mxu1 %v1758_v5  ;;  %1624 = vmatpush3.bf16.msra.mxu0 %v1761_v6 }
 0x131   : > { %1283 = vmatprep.subr.bf16.mxu1 %v1764_v7  ;;  %1625 = vmatprep.subr.bf16.mxu0 %v1786_v44 }
 0x134   : > { %1284 = vmatpush1.bf16.msra.mxu1 %v1762_v8  ;;  %1626 = vmatpush3.bf16.msra.mxu0 %v1765_v9 }
 0x135   : > { %1285 = vmatprep.subr.bf16.mxu1 %v1768_v10  ;;  %1627 = vmatprep.subr.bf16.mxu0 %v1786_v44 }
 0x138   : > { %1286 = vmatpush1.bf16.msra.mxu1 %v1766_v11  ;;  %1628 = vmatpush3.bf16.msra.mxu0 %v1769_v12 }
 0x139   : > { %1287 = vmatprep.subr.bf16.mxu1 %v1772_v13  ;;  %1629 = vmatprep.subr.bf16.mxu0 %v1786_v44 }
 0x13c   : > { %1288 = vmatpush1.bf16.msra.mxu1 %v1770_v14  ;;  %1630 = vmatpush3.bf16.msra.mxu0 %v1773_v15 }
 0x13d   : > { %1289 = vmatprep.subr.bf16.mxu1 %v1776_v16  ;;  %1631 = vmatprep.subr.bf16.mxu0 %v1786_v44 }
 0x140   : > { %1290 = vmatpush1.bf16.msra.mxu1 %v1774_v17  ;;  %1632 = vmatpush3.bf16.msra.mxu0 %v1777_v18 }
 0x143   : > { %1308 = vmatmul.mubr.bf16.vlgmr.msra.gmra.mrb[12].mxu1 %v803_v61  ;;  %1634 = vmatmul.mubr.bf16.vlgmr.msra.gmra.mrb[12].mxu0 %v803_v61 }
 0x1f6   : > { %v1227_v44 = vpop.f32.mrb[8].mxu1  ;;  %v1268_v30 = vpop.f32.mrb[8].mxu0 }
 0x1f7   : > { %v1228_v31 = vadd.f32 %v1227_v44, %v873_v26  ;;  %v1269_v32 = vadd.f32 %v1268_v30, %v881_v27  ;;  %v1229_v33 = vpop.f32.mrb[9].mxu1  ;;  %v1270_v34 = vpop.f32.mrb[9].mxu0 }
 0x1f8   : > { %v1230_v35 = vadd.f32 %v1229_v33, %v877_v28  ;;  %v1271_v36 = vadd.f32 %v1270_v34, %v885_v29  ;;  %v1231_v37 = vpop.f32.mrb[10].mxu1  ;;  %v1272_v38 = vpop.f32.mrb[10].mxu0 }
 0x1f9   : > { %1356 = vst [vmem:[%s2188_s10] sm:$0xff] %v1228_v31  ;;  %1358 = vst [vmem:[%s2188_s10 + $0x10] sm:$0xff] %v1269_v32  ;;  %v1232_v39 = vpop.f32.mrb[11].mxu1  ;;  %v1273_v40 = vpop.f32.mrb[11].mxu0 }
 0x1fa   : > { %1357 = vst [vmem:[%s2188_s10 + $0x8] sm:$0xff] %v1230_v35  ;;  %1359 = vst [vmem:[%s2188_s10 + $0x18] sm:$0xff] %v1271_v36 }
 0x216   : > { %v1309_v48 = vpop.f32.mrb[12].mxu1  ;;  %v1350_v49 = vpop.f32.mrb[12].mxu0 }
 0x217   : > { %v1310_v50 = vadd.f32 %v1309_v48, %v889_v45  ;;  %v1351_v51 = vadd.f32 %v1350_v49, %v897_v46  ;;  %v1311_v52 = vpop.f32.mrb[13].mxu1  ;;  %v1635_v53 = vpop.f32.mrb[13].mxu0 }
 0x218   : > { %v1312_v54 = vadd.f32 %v1311_v52, %v893_v47  ;;  %v1313_v55 = vpop.f32.mrb[14].mxu1  ;;  %v1353_v56 = vpop.f32.mrb[14].mxu0 }
 0x219   : > { %1360 = vst [vmem:[%s2188_s10 + $0x20] sm:$0xff] %v1310_v50  ;;  %1362 = vst.msk [vmem:[%s2188_s10 + $0x30] sm:$0xff] %vm639_vm1, %v1351_v51  ;;  %v1314_v57 = vpop.f32.mrb[15].mxu1  ;;  %v1636_v58 = vpop.f32.mrb[15].mxu0 }
 0x21a   : > { %1361 = vst [vmem:[%s2188_s10 + $0x28] sm:$0xff] %v1312_v54 }
 0x21b PF: > { %s15_s18 = sadd.s32 1, %s1784_s18  }
 0x21c   : > { %p12_p4 = scmp.ge.s32.totalorder %s15_s18, 4  }
 0x21e   :  { %14 = sbr.rel (!%p12_p4) target bundleno = 1 (0x1), region = 70 }

</bundles_post_ra>
